<compile_context>
chip_gen: v5e
topology: v5e:2x2
jax: 0.10.0
libtpu: 0.0.40
codegen_flags: <defaults>
</compile_context>

<pallas_src>
import functools

import jax
import jax.numpy as jnp
from jax.experimental import pallas as pl
from jax.experimental.pallas import tpu as pltpu


# ---------------------------------------------------------------------------
# Shared epilogue: params -> (mu, logvar), z, per-example KL
# ---------------------------------------------------------------------------
def _sample_kl_epilogue(params, b_ref, eps_ref, mu_ref, logvar_ref, z_ref, kl_ref):
    L = mu_ref.shape[-1]
    params = params + b_ref[...]                    # (tm, 2L), f32
    mu = params[:, :L]                              # lane-aligned when L % 128 == 0
    logvar = params[:, L:]

    std = jnp.exp(0.5 * logvar)                     # single EUP transcendental
    z = mu + std * eps_ref[...].astype(jnp.float32)

    # exp(logvar) == std * std : VPU multiply instead of a second EUP exp.
    kl_terms = 1.0 + logvar - mu * mu - std * std
    kl_per_example = -0.5 * jnp.sum(kl_terms, axis=-1)        # (tm,)

    mu_ref[...] = mu.astype(mu_ref.dtype)
    logvar_ref[...] = logvar.astype(logvar_ref.dtype)
    z_ref[...] = z.astype(z_ref.dtype)              # bf16 writeback
    kl_ref[...] = kl_per_example[None, :]            # lane-dense (1, tm) row


# ---------------------------------------------------------------------------
# Kernel A (preferred): single pass over K, W resident in VMEM, no accumulator
# ---------------------------------------------------------------------------
def _latent_kernel_fused(x_ref, w_ref, b_ref, eps_ref,
                         mu_ref, logvar_ref, z_ref, kl_ref):
    # In-kernel bf16 cast of the activations (no separate XLA cast pass).
    x_bf = x_ref[...].astype(jnp.bfloat16)
    params = jnp.dot(x_bf, w_ref[...], preferred_element_type=jnp.float32)
    _sample_kl_epilogue(params, b_ref, eps_ref, mu_ref, logvar_ref, z_ref, kl_ref)


# ---------------------------------------------------------------------------
# Kernel B (fallback for very large H): K-tiled accumulator
# ---------------------------------------------------------------------------
def _latent_kernel_ktiled(x_ref, w_ref, b_ref, eps_ref,
                          mu_ref, logvar_ref, z_ref, kl_ref, acc_ref):
    k = pl.program_id(1)

    @pl.when(k == 0)
    def _init():
        acc_ref[...] = jnp.zeros_like(acc_ref)

    acc_ref[...] += jnp.dot(x_ref[...].astype(jnp.bfloat16), w_ref[...],
                            preferred_element_type=jnp.float32)

    @pl.when(k == pl.num_programs(1) - 1)
    def _epilogue():
        _sample_kl_epilogue(acc_ref[...], b_ref, eps_ref,
                            mu_ref, logvar_ref, z_ref, kl_ref)


# ---------------------------------------------------------------------------
# Tile selection / VMEM budgeting helpers
# ---------------------------------------------------------------------------
_VMEM_BUDGET = 40 * 1024 * 1024   # keep well inside v7x's 64 MiB physical VMEM


def _pick_tm(B):
    # Prefer >= 2 batch tiles (so the second v7x TensorCore gets work under
    # "parallel") with tm a multiple of 128 (unmasked, non-overlapping (1, tm)
    # KL stores); among those prefer tm=256 to fill the 256-wide MXU on v6e/v7x.
    for cand in (256, 128):
        if B % cand == 0 and B // cand >= 2:
            return cand
    for cand in (256, 128):
        if B % cand == 0:
            return cand
    return B   # small / ragged batch: single tile (block dim == full array dim)


def _pick_tk(H):
    # Fallback path only: fewer, larger K steps cut accumulator RMW + grid
    # overhead.  (The fused path uses tk == H.)
    for cand in (2048, 1024, 512, 256):
        if H % cand == 0:
            return cand
    return H


def _vmem_estimate_fused(H, L, tm):
    two_L = 2 * L
    x_b = 2 * tm * H * 4                 # f32 x, double-buffered
    w_b = 2 * H * two_L * 2              # bf16 W (resident)
    b_b = 2 * two_L * 4
    eps_b = 2 * tm * L * 2               # bf16 eps
    out_b = 2 * (2 * tm * L * 4 + tm * L * 2 + tm * 4)   # mu/logvar f32, z bf16, kl
    return x_b + w_b + b_b + eps_b + out_b


# ---------------------------------------------------------------------------
# Wrapper: projection + reparameterized sample + batch-mean KL, one pallas_call
# ---------------------------------------------------------------------------
@jax.jit
def latent_forward_sample_kl(x, w, b, eps):
    """x: [B, H] f32, w: [H, 2L] (bf16 preferred), b: [1, 2L] f32, eps: [B, L]
       -> (mu [B,L] f32, logvar [B,L] f32, z [B,L] bf16, kl scalar batch-mean)."""
    B, H = x.shape
    two_L = w.shape[1]
    L = two_L // 2
    assert two_L == 2 * L, "weight output dim must be 2 * latent_dim"
    assert eps.shape == (B, L)

    # W/bias are meant to be stored in these dtypes persistently (see init_params);
    # these casts are no-ops in the hot path.
    if w.dtype != jnp.bfloat16:
        w = w.astype(jnp.bfloat16)
    if b.dtype != jnp.float32:
        b = b.astype(jnp.float32)

    tm = _pick_tm(B)
    assert B % tm == 0

    out_shape = (
        jax.ShapeDtypeStruct((B, L), jnp.float32),    # mu
        jax.ShapeDtypeStruct((B, L), jnp.float32),    # logvar
        jax.ShapeDtypeStruct((B, L), jnp.bfloat16),   # z (bf16 writeback)
        jax.ShapeDtypeStruct((1, B), jnp.float32),    # per-example KL (lane-major)
    )

    fused_bytes = _vmem_estimate_fused(H, L, tm)

    if fused_bytes <= _VMEM_BUDGET:
        # --- Preferred path: no K axis, W resident in VMEM ------------------
        vmem_limit = int(min(48 * 1024 * 1024,
                             max(32 * 1024 * 1024, 2 * fused_bytes)))
        grid_spec = pltpu.PrefetchScalarGridSpec(
            num_scalar_prefetch=0,
            grid=(B // tm,),
            in_specs=[
                pl.BlockSpec((tm, H), lambda i: (i, 0)),        # x (f32)
                pl.BlockSpec((H, two_L), lambda i: (0, 0)),     # w resident
                pl.BlockSpec((1, two_L), lambda i: (0, 0)),     # b
                pl.BlockSpec((tm, L), lambda i: (i, 0)),        # eps (bf16)
            ],
            out_specs=(
                pl.BlockSpec((tm, L), lambda i: (i, 0)),        # mu
                pl.BlockSpec((tm, L), lambda i: (i, 0)),        # logvar
                pl.BlockSpec((tm, L), lambda i: (i, 0)),        # z
                pl.BlockSpec((1, tm), lambda i: (0, i)),        # kl row
            ),
        )
        mu, logvar, z, kl_row = pl.pallas_call(
            _latent_kernel_fused,
            out_shape=out_shape,
            grid_spec=grid_spec,
            compiler_params=pltpu.CompilerParams(
                dimension_semantics=("parallel",),
                vmem_limit_bytes=vmem_limit,
            ),
        )(x, w, b, eps)
    else:
        # --- Fallback path: K-tiled accumulator (very large H) --------------
        tk = _pick_tk(H)
        assert H % tk == 0
        grid_spec = pltpu.PrefetchScalarGridSpec(
            num_scalar_prefetch=0,
            grid=(B // tm, H // tk),
            in_specs=[
                pl.BlockSpec((tm, tk), lambda i, k: (i, k)),      # x
                pl.BlockSpec((tk, two_L), lambda i, k: (k, 0)),   # w streamed
                pl.BlockSpec((1, two_L), lambda i, k: (0, 0)),    # b
                pl.BlockSpec((tm, L), lambda i, k: (i, 0)),       # eps
            ],
            out_specs=(
                pl.BlockSpec((tm, L), lambda i, k: (i, 0)),
                pl.BlockSpec((tm, L), lambda i, k: (i, 0)),
                pl.BlockSpec((tm, L), lambda i, k: (i, 0)),
                pl.BlockSpec((1, tm), lambda i, k: (0, i)),
            ),
            scratch_shapes=[pltpu.VMEM((tm, two_L), jnp.float32)],
        )
        mu, logvar, z, kl_row = pl.pallas_call(
            _latent_kernel_ktiled,
            out_shape=out_shape,
            grid_spec=grid_spec,
            compiler_params=pltpu.CompilerParams(
                dimension_semantics=("parallel", "arbitrary"),
                vmem_limit_bytes=48 * 1024 * 1024,
            ),
        )(x, w, b, eps)

    kl = jnp.mean(kl_row)   # trivial glue: batch-averaged scalar
    return mu, logvar, z, kl


# ---------------------------------------------------------------------------
# Deterministic parameter init (W stored bf16 once; no per-call casts)
# ---------------------------------------------------------------------------
def init_params(key, hidden_dim, latent_dim):
    k_w, k_b = jax.random.split(key)
    scale = 1.0 / jnp.sqrt(hidden_dim)
    w = jax.random.uniform(
        k_w, (hidden_dim, 2 * latent_dim), jnp.float32, -scale, scale
    ).astype(jnp.bfloat16)                                   # persistent bf16 storage
    b = jax.random.uniform(
        k_b, (1, 2 * latent_dim), jnp.float32, -scale, scale
    )
    return w, b


if __name__ == "__main__":
    key = jax.random.PRNGKey(0)
    k_x, k_p, k_eps = jax.random.split(key, 3)

    # Small but lane-aligned shapes: latent dim multiple of 128 keeps the
    # [mu | logvar] split and all stores unmasked.
    B, H, L = 8, 256, 128   # batch, encoder hidden dim, latent dim

    x = jax.random.normal(k_x, (B, H), jnp.float32)
    w, b = init_params(k_p, H, L)
    eps = jax.random.normal(k_eps, (B, L), jnp.bfloat16)     # bf16 noise (ample precision)

    mu, logvar, z, kl = latent_forward_sample_kl(x, w, b, eps)
    jax.block_until_ready((mu, logvar, z, kl))

    # Pure-JAX reference with the same bf16-in / f32-accumulate matmul contract.
    params_ref = jnp.dot(
        x.astype(jnp.bfloat16), w, preferred_element_type=jnp.float32
    ) + b
    mu_ref, logvar_ref = params_ref[:, :L], params_ref[:, L:]
    std_ref = jnp.exp(0.5 * logvar_ref)
    z_ref = mu_ref + std_ref * eps.astype(jnp.float32)
    kl_ref = jnp.mean(
        jnp.sum(
            -0.5 * (1.0 + logvar_ref - mu_ref**2 - jnp.exp(logvar_ref)), axis=-1
        )
    )

    assert jnp.allclose(mu, mu_ref, atol=1e-3, rtol=1e-3)
    assert jnp.allclose(logvar, logvar_ref, atol=1e-3, rtol=1e-3)
    assert jnp.allclose(
        z.astype(jnp.float32),
        z_ref.astype(jnp.bfloat16).astype(jnp.float32),
        atol=2e-2, rtol=2e-2,
    )
    assert jnp.allclose(kl, kl_ref, atol=1e-2, rtol=1e-3)

    print("KERNEL_OK")
</pallas_src>

<mosaic_0001>
module attributes {stable_mosaic.version = 11 : i64} {
  func.func @_latent_kernel_fused(%arg0: i32, %arg1: memref<8x256xf32, #tpu.memory_space<vmem>>, %arg2: memref<256x256xbf16, #tpu.memory_space<vmem>>, %arg3: memref<1x256xf32, #tpu.memory_space<vmem>>, %arg4: memref<8x128xbf16, #tpu.memory_space<vmem>>, %arg5: memref<8x128xf32, #tpu.memory_space<vmem>>, %arg6: memref<8x128xf32, #tpu.memory_space<vmem>>, %arg7: memref<8x128xbf16, #tpu.memory_space<vmem>>, %arg8: memref<1x8xf32, #tpu.memory_space<vmem>>) attributes {dimension_semantics = [#tpu.dimension_semantics<parallel>], iteration_bounds = array<i64: 1>, scalar_prefetch = 0 : i64, scratch_operands = 0 : i64, tpu.core_type = #tpu.core_type<tc>, window_params = [{transform_indices = @transform_0, window_bounds = array<i64: 8, 256>}, {pipeline_mode = #tpu.pipeline_mode<synchronous>, transform_indices = @transform_1, window_bounds = array<i64: 256, 256>}, {pipeline_mode = #tpu.pipeline_mode<synchronous>, transform_indices = @transform_2, window_bounds = array<i64: 1, 256>}, {transform_indices = @transform_3, window_bounds = array<i64: 8, 128>}, {transform_indices = @transform_4, window_bounds = array<i64: 8, 128>}, {transform_indices = @transform_5, window_bounds = array<i64: 8, 128>}, {transform_indices = @transform_6, window_bounds = array<i64: 8, 128>}, {transform_indices = @transform_7, window_bounds = array<i64: 1, 8>}]} {
    %c0 = arith.constant 0 : index
    %c0_0 = arith.constant 0 : index
    %0 = vector.load %arg1[%c0, %c0_0] : memref<8x256xf32, #tpu.memory_space<vmem>>, vector<8x256xf32>
    %1 = arith.truncf %0 : vector<8x256xf32> to vector<8x256xbf16>
    %c0_1 = arith.constant 0 : index
    %c0_2 = arith.constant 0 : index
    %2 = vector.load %arg2[%c0_1, %c0_2] : memref<256x256xbf16, #tpu.memory_space<vmem>>, vector<256x256xbf16>
    %cst = arith.constant dense<0.000000e+00> : vector<8x256xf32>
    %3 = tpu.matmul %1, %2, %cst {dimension_numbers = #tpu.dot_dimension_numbers<[1], [0], [0], [1], [0, 0, 1, 1], [], []>} : vector<8x256xbf16>, vector<256x256xbf16>, vector<8x256xf32> -> vector<8x256xf32>
    %c0_3 = arith.constant 0 : index
    %c0_4 = arith.constant 0 : index
    %4 = vector.load %arg3[%c0_3, %c0_4] : memref<1x256xf32, #tpu.memory_space<vmem>>, vector<1x256xf32>
    %5 = vector.broadcast %4 : vector<1x256xf32> to vector<8x256xf32>
    %6 = arith.addf %3, %5 : vector<8x256xf32>
    %7 = vector.extract_strided_slice %6 {offsets = [0, 0], sizes = [8, 128], strides = [1, 1]} : vector<8x256xf32> to vector<8x128xf32>
    %8 = vector.extract_strided_slice %6 {offsets = [0, 128], sizes = [8, 128], strides = [1, 1]} : vector<8x256xf32> to vector<8x128xf32>
    %cst_5 = arith.constant 5.000000e-01 : f32
    %9 = vector.broadcast %cst_5 : f32 to vector<8x128xf32>
    %10 = arith.mulf %9, %8 : vector<8x128xf32>
    %11 = math.exp %10 : vector<8x128xf32>
    %c0_6 = arith.constant 0 : index
    %c0_7 = arith.constant 0 : index
    %12 = vector.load %arg4[%c0_6, %c0_7] : memref<8x128xbf16, #tpu.memory_space<vmem>>, vector<8x128xbf16>
    %13 = arith.extf %12 : vector<8x128xbf16> to vector<8x128xf32>
    %14 = arith.mulf %11, %13 : vector<8x128xf32>
    %15 = arith.addf %7, %14 : vector<8x128xf32>
    %cst_8 = arith.constant 1.000000e+00 : f32
    %16 = vector.broadcast %cst_8 : f32 to vector<8x128xf32>
    %17 = arith.addf %16, %8 : vector<8x128xf32>
    %18 = arith.mulf %7, %7 : vector<8x128xf32>
    %19 = arith.subf %17, %18 : vector<8x128xf32>
    %20 = arith.mulf %11, %11 : vector<8x128xf32>
    %21 = arith.subf %19, %20 : vector<8x128xf32>
    %cst_9 = arith.constant dense<0.000000e+00> : vector<8xf32>
    %22 = vector.multi_reduction <add>, %21, %cst_9 [1] : vector<8x128xf32> to vector<8xf32>
    %cst_10 = arith.constant -5.000000e-01 : f32
    %23 = vector.broadcast %cst_10 : f32 to vector<8xf32>
    %24 = arith.mulf %23, %22 : vector<8xf32>
    %c0_11 = arith.constant 0 : index
    %c0_12 = arith.constant 0 : index
    %25 = vector.load %arg5[%c0_11, %c0_12] : memref<8x128xf32, #tpu.memory_space<vmem>>, vector<8x128xf32>
    tpu.vector_store %arg5[%c0_11, %c0_12], %7 {strides = array<i32>} : memref<8x128xf32, #tpu.memory_space<vmem>>, vector<8x128xf32>,
    %c0_13 = arith.constant 0 : index
    %c0_14 = arith.constant 0 : index
    %26 = vector.load %arg6[%c0_13, %c0_14] : memref<8x128xf32, #tpu.memory_space<vmem>>, vector<8x128xf32>
    tpu.vector_store %arg6[%c0_13, %c0_14], %8 {strides = array<i32>} : memref<8x128xf32, #tpu.memory_space<vmem>>, vector<8x128xf32>,
    %27 = arith.truncf %15 : vector<8x128xf32> to vector<8x128xbf16>
    %c0_15 = arith.constant 0 : index
    %c0_16 = arith.constant 0 : index
    %28 = vector.load %arg7[%c0_15, %c0_16] : memref<8x128xbf16, #tpu.memory_space<vmem>>, vector<8x128xbf16>
    tpu.vector_store %arg7[%c0_15, %c0_16], %27 {strides = array<i32>} : memref<8x128xbf16, #tpu.memory_space<vmem>>, vector<8x128xbf16>,
    %29 = vector.shape_cast %24 : vector<8xf32> to vector<1x8xf32>
    %c0_17 = arith.constant 0 : index
    %c0_18 = arith.constant 0 : index
    %30 = vector.load %arg8[%c0_17, %c0_18] : memref<1x8xf32, #tpu.memory_space<vmem>>, vector<1x8xf32>
    tpu.vector_store %arg8[%c0_17, %c0_18], %29 {strides = array<i32>} : memref<1x8xf32, #tpu.memory_space<vmem>>, vector<1x8xf32>,
    return
  }
  func.func @transform_0(%arg0: i32) -> (i32, i32) {
    %c0_i32 = arith.constant 0 : i32
    %c0_i32_0 = arith.constant 0 : i32
    return %arg0, %c0_i32 : i32, i32
  }
  func.func @transform_1(%arg0: i32) -> (i32, i32) {
    %c0_i32 = arith.constant 0 : i32
    %c0_i32_0 = arith.constant 0 : i32
    %c0_i32_1 = arith.constant 0 : i32
    return %c0_i32, %c0_i32_0 : i32, i32
  }
  func.func @transform_2(%arg0: i32) -> (i32, i32) {
    %c0_i32 = arith.constant 0 : i32
    %c0_i32_0 = arith.constant 0 : i32
    %c0_i32_1 = arith.constant 0 : i32
    return %c0_i32, %c0_i32_0 : i32, i32
  }
  func.func @transform_3(%arg0: i32) -> (i32, i32) {
    %c0_i32 = arith.constant 0 : i32
    %c0_i32_0 = arith.constant 0 : i32
    return %arg0, %c0_i32 : i32, i32
  }
  func.func @transform_4(%arg0: i32) -> (i32, i32) {
    %c0_i32 = arith.constant 0 : i32
    %c0_i32_0 = arith.constant 0 : i32
    return %arg0, %c0_i32 : i32, i32
  }
  func.func @transform_5(%arg0: i32) -> (i32, i32) {
    %c0_i32 = arith.constant 0 : i32
    %c0_i32_0 = arith.constant 0 : i32
    return %arg0, %c0_i32 : i32, i32
  }
  func.func @transform_6(%arg0: i32) -> (i32, i32) {
    %c0_i32 = arith.constant 0 : i32
    %c0_i32_0 = arith.constant 0 : i32
    return %arg0, %c0_i32 : i32, i32
  }
  func.func @transform_7(%arg0: i32) -> (i32, i32) {
    %c0_i32 = arith.constant 0 : i32
    %c0_i32_0 = arith.constant 0 : i32
    return %c0_i32, %arg0 : i32, i32
  }
}

</mosaic_0001>

<bundles_post_ra>
// kernel: latent_forward_sample_kl.1
= control target key start
LH: loop header
LB: loop body
LE: loop exit
PB: predicated region body
PF: predicated region fallthrough
CT: control target
= control target key end

     0   :  { %13 = vsyncpa [#allocation3], 0  ;;  %s836_s0 = inlined_call_operand.hbm [shape: f32[8,256], index: 0, kind: input, shape index: {}]   ;;  %s837_s1 = inlined_call_operand.hbm [shape: bf16[256,256], index: 1, kind: input, shape index: {}]   ;;  %s838_s2 = inlined_call_operand.hbm [shape: f32[1,256], index: 2, kind: input, shape index: {}]   ;;  %s839_s3 = inlined_call_operand.hbm [shape: bf16[8,128], index: 3, kind: input, shape index: {}]   ;;  %s840_s4 = inlined_call_operand.hbm [shape: f32[8,128], index: 4, kind: output, shape index: {0}]   ;;  %s841_s5 = inlined_call_operand.hbm [shape: f32[8,128], index: 5, kind: output, shape index: {1}]   ;;  %s842_s6 = inlined_call_operand.hbm [shape: bf16[8,128], index: 6, kind: output, shape index: {2}]   ;;  %s843_s7 = inlined_call_operand.vmem [shape: f32[1,8], index: 7, kind: output, shape index: {3}]  }
   0x1   :  { %14 = vsyncpa [#allocation6], 0 }
   0x2   :  { %15 = vsyncpa [#allocation9], 0 }
   0x3   :  { %16 = vsyncpa [#allocation4], 0  ;;  %s33_s26 = sshll.u32 %s837_s1, 4  ;;  %s34_s26 = int_to_ptr.hbm [resolvable:$true] %s33_s26 }
   0x4   :  { %17 = vsyncpa [#allocation12], 0  ;;  %s763_s27 = smov [#allocation5]   ;;  %s23_s8 = sshll.u32 %s836_s0, 4  ;;  %s24_s8 = int_to_ptr.hbm [resolvable:$true] %s23_s8 }
   0x5   :  { %s35_s28 = sshll.u32 %s763_s27, 4  ;;  %s764_s9 = smov 128   ;;  %s36_s28 = int_to_ptr.vmem [resolvable:$true] %s35_s28 }
   0x6   :  { %s765_s10 = smov 8   ;;  %s766_s11 = smov [#allocation2]  }
   0x7   :  { %41 = dma.hbm_to_vmem [thread:$0]  %s34_s26, 4096, %s36_s28, [#allocation6], %s764_s9, %s764_s9, %s765_s10  }
   0x8   :  { %s25_s12 = sshll.u32 %s766_s11, 4  ;;  %s47_s15 = sshll.u32 %s838_s2, 4  ;;  %s26_s12 = int_to_ptr.vmem [resolvable:$true] %s25_s12  ;;  %s48_s15 = int_to_ptr.hbm [resolvable:$true] %s47_s15 }
   0x9   :  { %28 = dma.hbm_to_vmem [thread:$0]  %s24_s8, 256, %s26_s12, [#allocation3]  }
   0xa   :  { %s58_s17 = sshll.u32 %s839_s3, 4  ;;  %s767_s18 = smov [#allocation7]   ;;  %s59_s17 = int_to_ptr.hbm [resolvable:$true] %s58_s17 }
   0xb   :  { %s49_s19 = sshll.u32 %s767_s18, 4  ;;  %s768_s0 = smov [#allocation8]   ;;  %s50_s19 = int_to_ptr.vmem [resolvable:$true] %s49_s19 }
   0xc   :  { %52 = dma.hbm_to_vmem [thread:$0]  %s48_s15, 32, %s50_s19, [#allocation6]  }
   0xd   :  { %s60_s20 = sshll.u32 %s768_s0, 4  ;;  %s61_s20 = int_to_ptr.vmem [resolvable:$true] %s60_s20 }
   0xe   :  { %63 = dma.hbm_to_vmem [thread:$0]  %s59_s17, 64, %s61_s20, [#allocation9]  }
   0xf   :  { %753 = dma.done.wait [#allocation3], 256  }
  0x10   :  { %754 = vsyncadd [#allocation3], 4294967040 }
  0x11   :  { %755 = dma.done.wait [#allocation6], 4128  }
  0x12   :  { %756 = vsyncadd [#allocation6], 4294963168 }
  0x13   :  { %757 = dma.done.wait [#allocation9], 64  }
  0x14   :  { %758 = vsyncadd [#allocation9], 4294967232  ;;  %v556_v0 = vld [vmem:[#allocation5 + $0x74] sm:$0xf]  ;;  %v474_v1 = vld [vmem:[#allocation5 + $0x78] sm:$0xf0] }
  0x15   :  { %v572_v2 = vld [vmem:[#allocation5 + $0xf4] sm:$0xf]  ;;  %v477_v3 = vor.u32 %v556_v0, %v474_v1  ;;  %v538_v4 = vld [vmem:[#allocation5 + $0xf8] sm:$0xf0]  ;;  %v554_v5 = vld [vmem:[#allocation5 + $0x64] sm:$0xf] }
  0x16   :  { %v466_v6 = vld [vmem:[#allocation5 + $0x68] sm:$0xf0]  ;;  %v541_v7 = vor.u32 %v572_v2, %v538_v4  ;;  %v570_v8 = vld [vmem:[#allocation5 + $0xe4] sm:$0xf]  ;;  %v472_v10 = vld [vmem:[#allocation5 + $0x70] sm:$0xf] }
  0x17   :  { %v530_v9 = vld [vmem:[#allocation5 + $0xe8] sm:$0xf0]  ;;  %308 = vmatpush.bf16.msra.mxu2 %v477_v3  ;;  %v469_v11 = vor.u32 %v554_v5, %v466_v6  ;;  %v557_v12 = vld [vmem:[#allocation5 + $0x74] sm:$0xf0]  ;;  %v536_v13 = vld [vmem:[#allocation5 + $0xf0] sm:$0xf] }
  0x18   :  { %v573_v14 = vld [vmem:[#allocation5 + $0xf4] sm:$0xf0]  ;;  %321 = vmatpush.bf16.msra.mxu3 %v541_v7  ;;  %v533_v15 = vor.u32 %v570_v8, %v530_v9  ;;  %v473_v16 = vor.u32 %v557_v12, %v472_v10  ;;  %v552_v18 = vld [vmem:[#allocation5 + $0x54] sm:$0xf]  ;;  %v458_v19 = vld [vmem:[#allocation5 + $0x58] sm:$0xf0] }
  0x19   :  { %v537_v17 = vor.u32 %v573_v14, %v536_v13  ;;  %v568_v20 = vld [vmem:[#allocation5 + $0xd4] sm:$0xf]  ;;  %v522_v21 = vld [vmem:[#allocation5 + $0xd8] sm:$0xf0]  ;;  %v464_v22 = vld [vmem:[#allocation5 + $0x60] sm:$0xf]  ;;  %v461_v27 = vor.u32 %v552_v18, %v458_v19 }
  0x1a   :  { %v555_v23 = vld [vmem:[#allocation5 + $0x64] sm:$0xf0]  ;;  %282 = vmatpush.bf16.msra.mxu0 %v473_v16  ;;  %v528_v25 = vld [vmem:[#allocation5 + $0xe0] sm:$0xf]  ;;  %v550_v29 = vld [vmem:[#allocation5 + $0x44] sm:$0xf]  ;;  %v525_v31 = vor.u32 %v568_v20, %v522_v21 }
  0x1b   :  { %295 = vmatpush.bf16.msra.mxu1 %v537_v17  ;;  %v465_v24 = vor.u32 %v555_v23, %v464_v22  ;;  %v571_v26 = vld [vmem:[#allocation5 + $0xe4] sm:$0xf0]  ;;  %309 = vmatpush.bf16.msra.mxu2 %v469_v11  ;;  %v450_v30 = vld [vmem:[#allocation5 + $0x48] sm:$0xf0]  ;;  %v456_v32 = vld [vmem:[#allocation5 + $0x50] sm:$0xf] }
  0x1c   :  { %v529_v28 = vor.u32 %v571_v26, %v528_v25  ;;  %322 = vmatpush.bf16.msra.mxu3 %v533_v15  ;;  %v553_v33 = vld [vmem:[#allocation5 + $0x54] sm:$0xf0]  ;;  %v520_v34 = vld [vmem:[#allocation5 + $0xd0] sm:$0xf]  ;;  %v566_v35 = vld [vmem:[#allocation5 + $0xc4] sm:$0xf]  ;;  %v453_v41 = vor.u32 %v550_v29, %v450_v30 }
  0x1d   :  { %v514_v36 = vld [vmem:[#allocation5 + $0xc8] sm:$0xf0]  ;;  %v569_v37 = vld [vmem:[#allocation5 + $0xd4] sm:$0xf0]  ;;  %v457_v38 = vor.u32 %v553_v33, %v456_v32  ;;  %v448_v40 = vld [vmem:[#allocation5 + $0x40] sm:$0xf] }
  0x1e   :  { %283 = vmatpush.bf16.msra.mxu0 %v465_v24  ;;  %v521_v39 = vor.u32 %v569_v37, %v520_v34  ;;  %v551_v42 = vld [vmem:[#allocation5 + $0x44] sm:$0xf0]  ;;  %v512_v43 = vld [vmem:[#allocation5 + $0xc0] sm:$0xf]  ;;  %v517_v45 = vor.u32 %v566_v35, %v514_v36  ;;  %v548_v46 = vld [vmem:[#allocation5 + $0x34] sm:$0xf] }
  0x1f   :  { %296 = vmatpush.bf16.msra.mxu1 %v529_v28  ;;  %310 = vmatpush.bf16.msra.mxu2 %v461_v27  ;;  %v567_v44 = vld [vmem:[#allocation5 + $0xc4] sm:$0xf0]  ;;  %v442_v47 = vld [vmem:[#allocation5 + $0x38] sm:$0xf0]  ;;  %v564_v48 = vld [vmem:[#allocation5 + $0xb4] sm:$0xf]  ;;  %v449_v50 = vor.u32 %v551_v42, %v448_v40 }
  0x20   :  { %323 = vmatpush.bf16.msra.mxu3 %v525_v31  ;;  %v506_v49 = vld [vmem:[#allocation5 + $0xb8] sm:$0xf0]  ;;  %v513_v51 = vor.u32 %v567_v44, %v512_v43  ;;  %v440_v52 = vld [vmem:[#allocation5 + $0x30] sm:$0xf]  ;;  %v445_v53 = vor.u32 %v548_v46, %v442_v47  ;;  %v549_v54 = vld [vmem:[#allocation5 + $0x34] sm:$0xf0] }
  0x21   :  { %v504_v55 = vld [vmem:[#allocation5 + $0xb0] sm:$0xf]  ;;  %v565_v56 = vld [vmem:[#allocation5 + $0xb4] sm:$0xf0]  ;;  %v509_v57 = vor.u32 %v564_v48, %v506_v49  ;;  %v546_v58 = vld [vmem:[#allocation5 + $0x24] sm:$0xf]  ;;  %v441_v62 = vor.u32 %v549_v54, %v440_v52 }
  0x22   :  { %284 = vmatpush.bf16.msra.mxu0 %v457_v38  ;;  %v434_v59 = vld [vmem:[#allocation5 + $0x28] sm:$0xf0]  ;;  %v562_v60 = vld [vmem:[#allocation5 + $0xa4] sm:$0xf]  ;;  %v505_v63 = vor.u32 %v565_v56, %v504_v55  ;;  %v432_v0 = vld [vmem:[#allocation5 + $0x20] sm:$0xf] }
  0x23   :  { %297 = vmatpush.bf16.msra.mxu1 %v521_v39  ;;  %311 = vmatpush.bf16.msra.mxu2 %v453_v41  ;;  %v498_v61 = vld [vmem:[#allocation5 + $0xa8] sm:$0xf0]  ;;  %v437_v1 = vor.u32 %v546_v58, %v434_v59  ;;  %v547_v2 = vld [vmem:[#allocation5 + $0x24] sm:$0xf0]  ;;  %v496_v3 = vld [vmem:[#allocation5 + $0xa0] sm:$0xf] }
  0x24   :  { %324 = vmatpush.bf16.msra.mxu3 %v517_v45  ;;  %v563_v4 = vld [vmem:[#allocation5 + $0xa4] sm:$0xf0]  ;;  %v501_v5 = vor.u32 %v562_v60, %v498_v61  ;;  %v544_v6 = vld [vmem:[#allocation5 + $0x14] sm:$0xf]  ;;  %v426_v7 = vld [vmem:[#allocation5 + $0x18] sm:$0xf0]  ;;  %v433_v10 = vor.u32 %v547_v2, %v432_v0  ;;  %v354_v0 = vlaneseq }
  0x25   :  { %v560_v8 = vld [vmem:[#allocation5 + $0x94] sm:$0xf]  ;;  %v490_v9 = vld [vmem:[#allocation5 + $0x98] sm:$0xf0]  ;;  %v497_v11 = vor.u32 %v563_v4, %v496_v3  ;;  %v424_v12 = vld [vmem:[#allocation5 + $0x10] sm:$0xf]  ;;  %v429_v13 = vor.u32 %v544_v6, %v426_v7 }
  0x26   :  { %285 = vmatpush.bf16.msra.mxu0 %v449_v50  ;;  %v545_v14 = vld [vmem:[#allocation5 + $0x14] sm:$0xf0]  ;;  %v488_v15 = vld [vmem:[#allocation5 + $0x90] sm:$0xf]  ;;  %v493_v17 = vor.u32 %v560_v8, %v490_v9  ;;  %v542_v18 = vld [vmem:[#allocation5 + $0x4] sm:$0xf] }
  0x27   :  { %298 = vmatpush.bf16.msra.mxu1 %v513_v51  ;;  %312 = vmatpush.bf16.msra.mxu2 %v445_v53  ;;  %v561_v16 = vld [vmem:[#allocation5 + $0x94] sm:$0xf0]  ;;  %v418_v19 = vld [vmem:[#allocation5 + $0x8] sm:$0xf0]  ;;  %v558_v20 = vld [vmem:[#allocation5 + $0x84] sm:$0xf]  ;;  %v425_v22 = vor.u32 %v545_v14, %v424_v12 }
  0x28   :  { %325 = vmatpush.bf16.msra.mxu3 %v509_v57  ;;  %v482_v21 = vld [vmem:[#allocation5 + $0x88] sm:$0xf0]  ;;  %v489_v23 = vor.u32 %v561_v16, %v488_v15  ;;  %v421_v24 = vor.u32 %v542_v18, %v418_v19  ;;  %v80_v25 = vld [vmem:[#allocation2] sm:$0xff]  ;;  %v416_v26 = vld [vmem:[#allocation5] sm:$0xf]  ;;  %s769_s2 = smov [#allocation11]  }
  0x29   :  { %v543_v27 = vld [vmem:[#allocation5 + $0x4] sm:$0xf0]  ;;  %v485_v28 = vor.u32 %v558_v20, %v482_v21  ;;  %v81_v29 = vld [vmem:[#allocation2 + $0x8] sm:$0xff]  ;;  %v480_v30 = vld [vmem:[#allocation5 + $0x80] sm:$0xf]  ;;  %v82_v32 = vpack.c.bf16 %v80_v25, %v80_v25  ;;  %s376_s3 = sshll.u32 %s769_s2, 4  ;;  %s377_s3 = int_to_ptr.vmem [resolvable:$true] %s376_s3 }
  0x2a   :  { %286 = vmatpush.bf16.msra.mxu0 %v441_v62  ;;  %v559_v31 = vld [vmem:[#allocation5 + $0x84] sm:$0xf0]  ;;  %v417_v33 = vor.u32 %v543_v27, %v416_v26  ;;  %v83_v34 = vpack.c.bf16 %v81_v29, %v81_v29  ;;  %v116_v36 = vld [vmem:[#allocation7] sm:$0x3]  ;;  %v337_v52 = vld [vmem:[#allocation8] sm:$0xf] }
  0x2b   :  { %299 = vmatpush.bf16.msra.mxu1 %v505_v63  ;;  %313 = vmatpush.bf16.msra.mxu2 %v437_v1  ;;  %v481_v35 = vor.u32 %v559_v31, %v480_v30  ;;  %v118_v37 = vperm.slane %v116_v36, 0  ;;  %v119_v39 = vperm.slane %v116_v36, 1  ;;  %s378_s23 = sshll.u32 %s841_s5, 4  ;;  %v338_v54 = vunpack.c.l.bf16 %v337_v52  ;;  %s367_s26 = sshll.u32 %s840_s4, 4  ;;  %s379_s23 = int_to_ptr.hbm [resolvable:$true] %s378_s23  ;;  %s368_s26 = int_to_ptr.hbm [resolvable:$true] %s367_s26 }
  0x2c   :  { %326 = vmatpush.bf16.msra.mxu3 %v501_v5  ;;  %s770_s27 = smov [#allocation10]   ;;  %s771_s5 = smov [#allocation13]   ;;  %v355_v1 = vand.u32 127, %v354_v0  ;;  %vm358_vm0 = vcmask 57344  }
  0x2d   :  { %s365_s28 = sshll.u32 %s770_s27, 4  ;;  %s387_s29 = sshll.u32 %s771_s5, 4  ;;  %s366_s28 = int_to_ptr.vmem [resolvable:$true] %s365_s28  ;;  %s388_s29 = int_to_ptr.vmem [resolvable:$true] %s387_s29 }
  0x2e   :  { %287 = vmatpush.bf16.msra.mxu0 %v433_v10  ;;  %s389_s9 = sshll.u32 %s842_s6, 4  ;;  %s390_s9 = int_to_ptr.hbm [resolvable:$true] %s389_s9 }
  0x2f   :  { %300 = vmatpush.bf16.msra.mxu1 %v497_v11  ;;  %314 = vmatpush.bf16.msra.mxu2 %v429_v13 }
  0x30   :  { %327 = vmatpush.bf16.msra.mxu3 %v493_v17 }
  0x32   :  { %288 = vmatpush.bf16.msra.mxu0 %v425_v22 }
  0x33   :  { %301 = vmatpush.bf16.msra.mxu1 %v489_v23  ;;  %315 = vmatpush.bf16.msra.mxu2 %v421_v24 }
  0x34   :  { %328 = vmatpush.bf16.msra.mxu3 %v485_v28 }
  0x36   :  { %316 = vmatmul.bf16.vlgmr.msra.gmra.mxu2 %v82_v32  ;;  %289 = vmatpush.bf16.msra.mxu0 %v417_v33 }
  0x37   :  { %329 = vmatmul.bf16.vlgmr.msra.gmra.mxu3 %v83_v34  ;;  %302 = vmatpush.bf16.msra.mxu1 %v481_v35 }
  0x39   :  { %290 = vmatmul.bf16.vlgmr.msra.gmra.mxu0 %v82_v32 }
  0x3a   :  { %303 = vmatmul.bf16.vlgmr.msra.gmra.mxu1 %v83_v34 }
  0xb6   :  { %v291_v38 = vpop.f32.mrf.mxu0 }
  0xb7   :  { %v292_v40 = vadd.f32 %v291_v38, %v118_v37  ;;  %v304_v41 = vpop.f32.mrf.mxu1 }
  0xb9   :  { %v317_v42 = vpop.f32.mrf.mxu2  ;;  %v305_v43 = vadd.f32 %v304_v41, %v292_v40 }
  0xba   :  { %v318_v44 = vadd.f32 %v317_v42, %v119_v39  ;;  %v330_v45 = vpop.f32.mrf.mxu3 }
  0xbb   :  { %349 = vst [vmem:[#allocation10] sm:$0xff] %v305_v43  ;;  %v342_v56 = vmul.f32 %v305_v43, %v305_v43 }
  0xbc   :  { %v331_v46 = vadd.f32 %v330_v45, %v318_v44  ;;  %370 = dma.vmem_to_hbm [thread:$0]  %s366_s28, 128, %s368_s26, [#allocation4]  }
  0xbe   :  { %v334_v47 = vmul.f32 0.5, %v331_v46  ;;  %350 = vst [vmem:[#allocation11] sm:$0xff] %v331_v46  ;;  %v293_v48 = vpop.f32.mrf.mxu0  ;;  %v341_v55 = vadd.f32 1.0, %v331_v46 }
  0xbf   :  { %v306_v49 = vpop.f32.mrf.mxu1  ;;  %381 = dma.vmem_to_hbm [thread:$0]  %s377_s3, 128, %s379_s23, [#allocation12]  }
  0xc0   :  { %v335_v50 = vmul.f32 1.442695, %v334_v47  ;;  %v343_v59 = vsub.f32 %v341_v55, %v342_v56 }
  0xc1   :  { %v319_v51 = vpop.f32.mrf.mxu2 }
  0xc2   :  { %583 = vpow2.f32 %v335_v50  ;;  %v332_v53 = vpop.f32.mrf.mxu3 }
  0xc8   :  { %v584_v57 = vpop.eup %583 }
  0xc9   :  { %v339_v58 = vmul.f32 %v584_v57, %v338_v54  ;;  %v344_v60 = vmul.f32 %v584_v57, %v584_v57 }
  0xcb   :  { %v340_v61 = vadd.f32 %v339_v58, %v305_v43  ;;  %v345_v62 = vsub.f32 %v343_v59, %v344_v60 }
  0xcd   :  { %v351_v63 = vpack.c.bf16 %v340_v61, %v340_v61  ;;  %346 = vadd.xlane.f32.xlu0 %v345_v62 }
  0xcf   :  { %352 = vst [vmem:[#allocation13] sm:$0xf] %v351_v63 }
  0xd0   :  { %392 = dma.vmem_to_hbm [thread:$0]  %s388_s29, 64, %s390_s9, [#allocation12]  }
 0x140   :  { %v347_v2 = vpop.xlane.xlu0 %346 }
 0x141   :  { %v348_v3 = vmul.f32 -0.5, %v347_v2 }
 0x143   :  { %v356_v4 = vperm.slane %v348_v3, %v355_v1 }
 0x145   :  { %359 = vst.msk [vmem:[%s843_s7] sm:$0x1] %vm358_vm0, %v356_v4 }
 0x146   :  { %759 = dma.done.wait [#allocation4], 128  }
 0x147   :  { %760 = vsyncadd [#allocation4], 4294967168 }
 0x148   :  { %761 = dma.done.wait [#allocation12], 192  }
 0x149   :  { %762 = vsyncadd [#allocation12], 4294967104 }
 0x14a   :  { %409 = vsyncpa [#allocation3], 1 }
 0x14b   :  { %410 = vsyncpa [#allocation6], 1 }
 0x14c   :  { %411 = vsyncpa [#allocation9], 1 }
 0x14d   :  { %412 = vsyncpa [#allocation4], 1 }
 0x14e   :  { %413 = vsyncpa [#allocation12], 1 }

</bundles_post_ra>
